<compile_context>
chip_gen: v7x
topology: tpu7x:2x2x1
jax: 0.10.0
libtpu: 0.0.40
codegen_flags: <defaults>
</compile_context>

<pallas_src>
import functools

import numpy as np

import jax
import jax.numpy as jnp
from jax.experimental import pallas as pl
from jax.experimental.pallas import tpu as pltpu

_BN_EPS = 1e-5


# ----------------------------------------------------------------------------
# pltpu.roll sign-convention probe (one tiny pallas_call, run once at startup)
# ----------------------------------------------------------------------------
def _roll_probe_kernel(x_ref, o_ref):
    o_ref[...] = pltpu.roll(x_ref[...], 3, axis=1)


def _roll_matches_numpy():
    """True iff pltpu.roll(x, s, axis) == jnp.roll(x, s, axis) on this backend.

    The tap shifts below only depend on the rotation direction; probing once keeps
    the kernel correct regardless of the Mosaic rotate convention.
    """
    x = jnp.arange(8 * 128, dtype=jnp.float32).reshape(8, 128)
    y = pl.pallas_call(
        _roll_probe_kernel,
        out_shape=jax.ShapeDtypeStruct((8, 128), jnp.float32),
    )(x)
    return bool(jnp.array_equal(y, jnp.roll(x, 3, axis=1)))


# ----------------------------------------------------------------------------
# Static SAME-padding boundary masks for the 9 taps (computed host-side once)
# ----------------------------------------------------------------------------
def _edge_masks(H, W):
    """(9, H*W) 0/1 masks: tap t=dy*3+dx is valid where (y+dy-1, x+dx-1) is in-image."""
    ys = np.arange(H).reshape(H, 1)
    xs = np.arange(W).reshape(1, W)
    masks = np.zeros((9, H * W), np.float32)
    for dy in range(3):
        for dx in range(3):
            oy, ox = dy - 1, dx - 1
            valid = (ys + oy >= 0) & (ys + oy < H) & (xs + ox >= 0) & (xs + ox < W)
            masks[dy * 3 + dx] = valid.reshape(-1).astype(np.float32)
    return jnp.asarray(masks)


# ----------------------------------------------------------------------------
# Fused Pallas kernel: full ResNet forward for one batch element per grid step
# ----------------------------------------------------------------------------
def _make_fused_resnet_kernel(H, W, F, roll_like_numpy):
    HW = H * W
    # Flat-index offset of tap (dy, dx); rolling the (F, HW) activation along lanes by
    # -offset (np.roll convention) aligns input pixel (y+dy-1, x+dx-1) with output (y, x).
    offs = [(dy - 1) * W + (dx - 1) for dy in range(3) for dx in range(3)]
    if roll_like_numpy:
        amounts = [(-o) % HW for o in offs]
    else:  # inverted convention: result[i] = x[(i + amount) % n]
        amounts = [o % HW for o in offs]

    def kernel(xin9_ref, masks_ref, w1_ref, wmain_ref, scales_ref, shifts_ref,
               wlast_ref, blast_ref, out_ref, col_ref):

        def affine(layer, v):                      # folded inference BatchNorm
            return v * scales_ref[layer] + shifts_ref[layer]

        def build_col(act):                        # act: (F, HW) f32 -> col_ref (9F, HW) bf16
            for t in range(9):
                if t == 4:                         # center tap: no shift, always valid
                    patch = act
                else:
                    patch = pltpu.roll(act, amounts[t], axis=1) * masks_ref[t:t + 1, :]
                col_ref[t * F:(t + 1) * F, :] = patch.astype(jnp.bfloat16)

        def conv_bn(layer, act):                   # F -> F conv as ONE K=9F MXU matmul
            build_col(act)
            out = jnp.dot(wmain_ref[layer - 1], col_ref[...],
                          preferred_element_type=jnp.float32)
            return affine(layer, out)

        x_row = xin9_ref[0, 4:5, :]                # (1, HW) original input (center tap)

        # ---- block1.conv1 (Cin=1): 9 VPU broadcast-FMAs on the wrapper-side im2col input.
        acc = jnp.zeros((F, HW), jnp.float32)
        for t in range(9):
            acc = acc + w1_ref[:, t:t + 1] * xin9_ref[0, t:t + 1, :]
        cur = jnp.maximum(affine(0, acc), 0.0)

        # ---- block1.conv2 + bn2 + residual (1-channel input broadcast over F) + relu
        cur = jnp.maximum(conv_bn(1, cur) + x_row, 0.0)

        # ---- blocks 2..4: conv1+bn+relu, conv2+bn+identity+relu
        layer = 2
        for _ in range(3):
            res = cur
            cur = jnp.maximum(conv_bn(layer, cur), 0.0)
            cur = jnp.maximum(conv_bn(layer + 1, cur) + res, 0.0)
            layer += 2

        # ---- conv_last (F -> 1): single matmul (weight sublane-padded to 8 rows,
        #      only row 0 is real), then bias + identity + relu, lane-dense store.
        build_col(cur)
        y8 = jnp.dot(wlast_ref[...], col_ref[...], preferred_element_type=jnp.float32)
        out_ref[0] = jnp.maximum(y8[0:1, :] + blast_ref[...] + x_row, 0.0)

    return kernel


# ----------------------------------------------------------------------------
# Parameter initialization (deterministic, PyTorch-default-like) + packing
# ----------------------------------------------------------------------------
def _conv_params(key, cin, cout):
    k1, k2 = jax.random.split(key)
    fan_in = cin * 9
    bound = 1.0 / (fan_in ** 0.5)
    w = jax.random.uniform(k1, (3, 3, cin, cout), jnp.float32, -bound, bound)
    b = jax.random.uniform(k2, (cout,), jnp.float32, -bound, bound)
    return w, b


def init_resnet_params(key, num_filters):
    """Raw f32 parameters for the 9 convolutions (HWIO weight layout)."""
    F = num_filters
    keys = jax.random.split(key, 9)
    cins = [1] + [F] * 7          # block1.conv1, block1.conv2, blocks2-4 conv1/conv2
    convs = [_conv_params(keys[i], cin, F) for i, cin in enumerate(cins)]
    w_last, b_last = _conv_params(keys[8], F, 1)
    return dict(convs=convs, w_last=w_last, b_last=b_last)


def pack_params(raw):
    """Repack raw parameters into the fused kernel's layouts (bf16 matmul weights)."""
    convs = raw["convs"]
    F = convs[1][0].shape[-1]
    inv = (1.0 + _BN_EPS) ** -0.5            # folded inference BatchNorm scale

    # block1.conv1: (3,3,1,F) -> (F, 9) f32, index [cout, tap]        (VPU FMA path)
    w1 = jnp.transpose(convs[0][0].reshape(9, F))
    # layers 1..7: (3,3,F,F) -> (F_out, 9*F_in) bf16, index [cout, tap*F + cin]
    wmain = jnp.stack([jnp.transpose(w, (3, 0, 1, 2)).reshape(F, 9 * F)
                       for (w, _) in convs[1:]]).astype(jnp.bfloat16)
    # folded BN (gamma=1, beta=0, mean=0, var=1) + conv bias -> per-channel scale/shift
    scales = jnp.full((8, F, 1), inv, jnp.float32)
    shifts = (jnp.stack([b for (_, b) in convs]) * inv).reshape(8, F, 1)
    # conv_last: (3,3,F,1) -> (8, 9F) bf16 (row 0 real, rows 1..7 zero for M=8 alignment)
    wl = jnp.transpose(raw["w_last"], (3, 0, 1, 2)).reshape(1, 9 * F)
    wlast = jnp.concatenate([wl, jnp.zeros((7, 9 * F), jnp.float32)]).astype(jnp.bfloat16)
    blast = raw["b_last"].reshape(1, 1).astype(jnp.float32)
    return dict(w1=w1, wmain=wmain, scales=scales, shifts=shifts,
                wlast=wlast, blast=blast)


# ----------------------------------------------------------------------------
# Full forward pass (NCHW in / NCHW out, matching the PyTorch module)
# ----------------------------------------------------------------------------
def resnet_forward(x_nchw, params, *, roll_like_numpy=True):
    N, C, H, W = x_nchw.shape
    assert C == 1, "ResNet input layer expects a single channel"
    F = params["w1"].shape[0]
    HW = H * W

    x = x_nchw[:, 0].astype(jnp.float32)                        # (N, H, W)
    # Wrapper-side im2col of the 1-channel input (tap 4 == x itself); ~9 KB per sample.
    xp = jnp.pad(x, ((0, 0), (1, 1), (1, 1)))
    xin9 = jnp.stack([xp[:, dy:dy + H, dx:dx + W].reshape(N, HW)
                      for dy in range(3) for dx in range(3)], axis=1)   # (N, 9, HW)
    masks = _edge_masks(H, W)                                   # (9, HW) 0/1 SAME-pad masks

    kernel = _make_fused_resnet_kernel(H, W, F, roll_like_numpy)
    out = pl.pallas_call(
        kernel,
        grid=(N,),
        in_specs=[
            pl.BlockSpec((1, 9, HW), lambda n: (n, 0, 0)),      # input im2col (per sample)
            pl.BlockSpec((9, HW), lambda n: (0, 0)),            # boundary masks
            pl.BlockSpec((F, 9), lambda n: (0, 0)),             # block1.conv1 weight (f32)
            pl.BlockSpec((7, F, 9 * F), lambda n: (0, 0, 0)),   # fused conv weights (bf16)
            pl.BlockSpec((8, F, 1), lambda n: (0, 0, 0)),       # folded BN scales
            pl.BlockSpec((8, F, 1), lambda n: (0, 0, 0)),       # folded BN shifts
            pl.BlockSpec((8, 9 * F), lambda n: (0, 0)),         # conv_last weight (bf16)
            pl.BlockSpec((1, 1), lambda n: (0, 0)),             # conv_last bias
        ],
        out_specs=pl.BlockSpec((1, 1, HW), lambda n: (n, 0, 0)),  # lane-dense output
        out_shape=jax.ShapeDtypeStruct((N, 1, HW), jnp.float32),
        scratch_shapes=[pltpu.VMEM((9 * F, HW), jnp.bfloat16)],   # im2col staging
        compiler_params=pltpu.CompilerParams(
            dimension_semantics=("parallel",)),                   # megacore over batch
    )(xin9, masks, params["w1"], params["wmain"], params["scales"],
      params["shifts"], params["wlast"], params["blast"])

    return out.reshape(N, 1, H, W)


# ----------------------------------------------------------------------------
# Pure-JAX reference (same math; MXU weights rounded to bf16 like the kernel)
# ----------------------------------------------------------------------------
def resnet_reference(x_nchw, raw):
    def rb(w):                                    # weights that hit the MXU as bf16
        return w.astype(jnp.bfloat16).astype(jnp.float32)

    def conv(x, w, b):                            # 3x3 SAME conv, NCHW
        return jax.lax.conv_general_dilated(
            x, jnp.transpose(w, (3, 2, 0, 1)), (1, 1), "SAME",
            dimension_numbers=("NCHW", "OIHW", "NCHW")) + b.reshape(1, -1, 1, 1)

    inv = (1.0 + _BN_EPS) ** -0.5                 # inference BatchNorm == scale by inv
    convs = raw["convs"]
    x = x_nchw.astype(jnp.float32)
    out = x
    for blk in range(4):
        w1, b1 = convs[2 * blk]
        w2, b2 = convs[2 * blk + 1]
        if blk > 0:
            w1 = rb(w1)
        ident = out
        out = jax.nn.relu(conv(out, w1, b1) * inv)
        out = jax.nn.relu(conv(out, rb(w2), b2) * inv + ident)
    out = conv(out, rb(raw["w_last"]), raw["b_last"]) + x
    return jax.nn.relu(out)


if __name__ == "__main__":
    key = jax.random.PRNGKey(0)
    k_x, k_p = jax.random.split(key)

    num_filters = 32
    x = jax.random.normal(k_x, (2, 1, 16, 16), jnp.float32)      # NCHW, 1 input channel
    raw = init_resnet_params(k_p, num_filters)
    params = pack_params(raw)

    roll_like_np = _roll_matches_numpy()
    fwd = jax.jit(functools.partial(resnet_forward, roll_like_numpy=roll_like_np))
    y = fwd(x, params)
    jax.block_until_ready(y)

    assert y.shape == (2, 1, 16, 16), y.shape

    y_ref = resnet_reference(x, raw)
    max_err = float(jnp.max(jnp.abs(y - y_ref)))
    assert bool(jnp.allclose(y, y_ref, rtol=5e-2, atol=5e-2)), f"max |err| = {max_err}"
    print("KERNEL_OK")
</pallas_src>

<mosaic_0001>
module attributes {stable_mosaic.version = 11 : i64} {
  func.func @_roll_probe_kernel(%arg0: memref<8x128xf32, #tpu.memory_space<vmem>>, %arg1: memref<8x128xf32, #tpu.memory_space<vmem>>) attributes {dimension_semantics = [], scalar_prefetch = 0 : i64, scratch_operands = 0 : i64, tpu.core_type = #tpu.core_type<tc>} {
    %c0 = arith.constant 0 : index
    %c0_0 = arith.constant 0 : index
    %0 = vector.load %arg0[%c0, %c0_0] : memref<8x128xf32, #tpu.memory_space<vmem>>, vector<8x128xf32>
    %c3_i32 = arith.constant 3 : i32
    %1 = tpu.dynamic_rotate %0 by %c3_i32 dim 1 : vector<8x128xf32>, i32 -> vector<8x128xf32>
    %c0_1 = arith.constant 0 : index
    %c0_2 = arith.constant 0 : index
    %2 = vector.load %arg1[%c0_1, %c0_2] : memref<8x128xf32, #tpu.memory_space<vmem>>, vector<8x128xf32>
    tpu.vector_store %arg1[%c0_1, %c0_2], %1 {strides = array<i32>} : memref<8x128xf32, #tpu.memory_space<vmem>>, vector<8x128xf32>,
    return
  }
}

</mosaic_0001>

<bundles_post_ra>
// kernel: tpu_custom_call.1
= control target key start
LH: loop header
LB: loop body
LE: loop exit
PB: predicated region body
PF: predicated region fallthrough
CT: control target
= control target key end

     0   :  { %6 = vsyncpa [#allocation3], 0  ;;  %s128_s0 = inlined_call_operand.hbm [shape: f32[8,128], index: 0, kind: input, shape index: {}]   ;;  %s129_s1 = inlined_call_operand.hbm [shape: f32[8,128], index: 1, kind: output, shape index: {}]  }
   0x1   :  { %7 = vsyncpa [#allocation4], 0  ;;  %s91_s6 = smov [#allocation2]   ;;  %s43_s10 = scalar_lea.hbm %s128_s0, 128 }
   0x2   :  { %s14_s7 = sshll.u32 %s91_s6, 4  ;;  %p44_p0 = scmp.ne.s32.totalorder %s128_s0, %s43_s10  ;;  %s15_s7 = int_to_ptr.vmem [resolvable:$true] %s14_s7 }
   0x3   :  { %p47_p1 = scmp.lt.u32.totalorder %s43_s10, %s128_s0 }
   0x5   :  { %p49_p2 = pnand %p47_p1, %p44_p0 }
   0x7   :  { %52 = shalt.err (!%p49_p2)
}
   0x8   :  { %s53_s15 = scalar_lea.vmem %s15_s7, 128  ;;  %p58_p4 = scmp.lt.s32.totalorder %s15_s7, %s15_s7 }
   0x9   :  { %p54_p3 = scmp.ne.s32.totalorder %s15_s7, %s53_s15  ;;  %p59_p5 = scmp.lt.s32.totalorder %s53_s15, %s53_s15 }
   0xb   :  { %p60_p6 = por %p59_p5, %p58_p4 }
   0xd   :  { %p61_p7 = pnand %p60_p6, %p54_p3 }
   0xf   :  { %64 = shalt.err (!%p61_p7)
}
  0x10   :  { %17 = dma.hbm_to_vmem [thread:$0]  %s128_s0, 128, %s15_s7, [#allocation3]  }
  0x11   :  { %87 = dma.done.wait [#allocation3], 128  }
  0x12   :  { %88 = vsyncadd [#allocation3], 4294967168  ;;  %v21_v0 = vld [vmem:[#allocation2] sm:$0xff]  ;;  %s92_s18 = smov 3   ;;  %s93_s19 = smov [#allocation5]  }
  0x13   :  { %22 = vrot.lane.b32.xlu0 %v21_v0, %s92_s18  ;;  %s31_s20 = sshll.u32 %s93_s19, 4  ;;  %s32_s20 = int_to_ptr.vmem [resolvable:$true] %s31_s20 }
  0x14   :  { %s65_s21 = scalar_lea.vmem %s32_s20, 128  ;;  %p70_p9 = scmp.lt.s32.totalorder %s32_s20, %s32_s20 }
  0x15   :  { %p66_p8 = scmp.ne.s32.totalorder %s32_s20, %s65_s21  ;;  %p71_p10 = scmp.lt.s32.totalorder %s65_s21, %s65_s21 }
  0x17   :  { %p72_p11 = por %p71_p10, %p70_p9 }
  0x19   :  { %p73_p12 = pnand %p72_p11, %p66_p8 }
  0x85   :  { %v23_v1 = vpop.permute.xlu0 %22 }
  0x86   :  { %24 = vst [vmem:[#allocation5] sm:$0xff] %v23_v1 }
  0x87   :  { %76 = shalt.err (!%p73_p12)
}
  0x88   :  { %s77_s0 = scalar_lea.hbm %s129_s1, 128 }
  0x89   :  { %p78_p13 = scmp.ne.s32.totalorder %s129_s1, %s77_s0  ;;  %p81_p0 = scmp.lt.u32.totalorder %s77_s0, %s129_s1 }
  0x8b   :  { %p83_p1 = pnand %p81_p0, %p78_p13 }
  0x8d   :  { %86 = shalt.err (!%p83_p1)
}
  0x8e   :  { %34 = dma.vmem_to_hbm [thread:$0]  %s32_s20, 128, %s129_s1, [#allocation4]  }
  0x8f   :  { %89 = dma.done.wait [#allocation4], 128  }
  0x90   :  { %90 = vsyncadd [#allocation4], 4294967168 }
  0x91   :  { %38 = vsyncpa [#allocation3], 1 }
  0x92   :  { %39 = vsyncpa [#allocation4], 1 }

</bundles_post_ra>
